<compile_context>
chip_gen: v7x
topology: tpu7x:2x2x1
jax: 0.10.0
libtpu: 0.0.40
codegen_flags: <defaults>
</compile_context>

<pallas_src>
import jax
import jax.numpy as jnp
from jax.experimental import pallas as pl
from jax.experimental.pallas import tpu as pltpu


def _cmp_wc_kernel(thr_ref, cl_ref, cr_ref, ll_ref, lr_ref, out_ref):
    """cl/cr: (tb, T) confidences; ll/lr: (tb, 1) lens; out: (tb, 3); thr: (1,) SMEM."""
    thr = thr_ref[0]

    # (word_confidence > threshold).sum over the word axis (lanes, XLU reduce).
    gl = jnp.sum((cl_ref[...] > thr).astype(jnp.float32), axis=-1, keepdims=True)
    gr = jnp.sum((cr_ref[...] > thr).astype(jnp.float32), axis=-1, keepdims=True)

    # torch.div(count, valid_len) — exact f32 division.
    pred_l = gl / ll_ref[...]
    pred_r = gr / lr_ref[...]

    # better_ear = max(pred_l, pred_r); pack all three into one store.
    out_ref[...] = jnp.concatenate(
        [pred_l, pred_r, jnp.maximum(pred_l, pred_r)], axis=-1)


def word_confidence_cmp(conf_l, conf_r, len_l, len_r, threshold, *, tb_rows=8192):
    """
    Args:
      conf_l, conf_r: [B, T] float32 padded word confidences (pad value 0.0)
      len_l,  len_r : [B, 1] (or [B]) float32 valid lengths (>= 1)
      threshold     : [1]    float32 learned threshold (nn.Parameter(0.5))
      tb_rows       : batch-rows per grid step (multiple of 8).
    Returns:
      pred_l, pred_r, better_ear : each [B, 1] float32
    """
    B, T = conf_l.shape
    len_l = len_l.reshape(B, 1).astype(jnp.float32)
    len_r = len_r.reshape(B, 1).astype(jnp.float32)

    # Sublane-align the batch and pick the tile; pad (rows only, no relayout)
    # just enough to make the grid clean.  Pad lengths with 1.0 so the dead
    # rows never divide by zero.
    b8 = ((B + 7) // 8) * 8
    tb = max(8, (min(tb_rows, b8) // 8) * 8)
    b_pad = ((b8 + tb - 1) // tb) * tb
    if b_pad != B:
        pad = b_pad - B
        conf_l = jnp.pad(conf_l, ((0, pad), (0, 0)))
        conf_r = jnp.pad(conf_r, ((0, pad), (0, 0)))
        len_l = jnp.pad(len_l, ((0, pad), (0, 0)), constant_values=1.0)
        len_r = jnp.pad(len_r, ((0, pad), (0, 0)), constant_values=1.0)

    grid = (b_pad // tb,)

    out = pl.pallas_call(
        _cmp_wc_kernel,
        out_shape=jax.ShapeDtypeStruct((b_pad, 3), jnp.float32),
        grid_spec=pltpu.PrefetchScalarGridSpec(
            num_scalar_prefetch=1,                         # threshold -> SMEM
            grid=grid,
            in_specs=[
                pl.BlockSpec((tb, T), lambda i, thr: (i, 0)),   # conf_l
                pl.BlockSpec((tb, T), lambda i, thr: (i, 0)),   # conf_r
                pl.BlockSpec((tb, 1), lambda i, thr: (i, 0)),   # len_l
                pl.BlockSpec((tb, 1), lambda i, thr: (i, 0)),   # len_r
            ],
            out_specs=pl.BlockSpec((tb, 3), lambda i, thr: (i, 0)),
        ),
        compiler_params=pltpu.CompilerParams(
            dimension_semantics=("parallel",),   # shard batch steps over TCs (v7x)
        ),
    )(threshold, conf_l, conf_r, len_l, len_r)

    pred_l = out[:B, 0:1]
    pred_r = out[:B, 1:2]
    better = out[:B, 2:3]
    return pred_l, pred_r, better


def _reference(conf_l, conf_r, len_l, len_r, threshold):
    thr = threshold[0]
    gl = jnp.sum((conf_l > thr).astype(jnp.float32), axis=1, keepdims=True)
    gr = jnp.sum((conf_r > thr).astype(jnp.float32), axis=1, keepdims=True)
    pred_l = gl / len_l
    pred_r = gr / len_r
    return pred_l, pred_r, jnp.maximum(pred_l, pred_r)


if __name__ == "__main__":
    key = jax.random.PRNGKey(0)
    k1, k2, k3, k4 = jax.random.split(key, 4)

    # word_confidence: [Batch, 10] as documented in CompareWordConfidence.
    B, T = 256, 10

    conf_l = jax.random.uniform(k1, (B, T), dtype=jnp.float32)
    conf_r = jax.random.uniform(k2, (B, T), dtype=jnp.float32)

    # Valid lengths in [1, T]; zero out positions past the valid length
    # (matching pad_sequence's 0.0 pad value).
    len_l_i = jax.random.randint(k3, (B,), 1, T + 1)
    len_r_i = jax.random.randint(k4, (B,), 1, T + 1)
    pos = jnp.arange(T)[None, :]
    conf_l = jnp.where(pos < len_l_i[:, None], conf_l, 0.0)
    conf_r = jnp.where(pos < len_r_i[:, None], conf_r, 0.0)

    len_l = len_l_i.astype(jnp.float32).reshape(B, 1)
    len_r = len_r_i.astype(jnp.float32).reshape(B, 1)

    # nn.Parameter(torch.tensor(0.5)) — deterministic init.
    threshold = jnp.array([0.5], dtype=jnp.float32)

    ref_l, ref_r, ref_b = _reference(conf_l, conf_r, len_l, len_r, threshold)

    # Default tile: whole batch in one block (maximal DMA per step).
    pred_l, pred_r, better = word_confidence_cmp(
        conf_l, conf_r, len_l, len_r, threshold)
    jax.block_until_ready((pred_l, pred_r, better))
    assert jnp.allclose(pred_l, ref_l, atol=1e-6, rtol=1e-6)
    assert jnp.allclose(pred_r, ref_r, atol=1e-6, rtol=1e-6)
    assert jnp.allclose(better, ref_b, atol=1e-6, rtol=1e-6)

    # Smaller tile: exercise the multi-step pipelined / "parallel" grid path.
    pred_l2, pred_r2, better2 = word_confidence_cmp(
        conf_l, conf_r, len_l, len_r, threshold, tb_rows=64)
    jax.block_until_ready((pred_l2, pred_r2, better2))
    assert jnp.allclose(pred_l2, ref_l, atol=1e-6, rtol=1e-6)
    assert jnp.allclose(pred_r2, ref_r, atol=1e-6, rtol=1e-6)
    assert jnp.allclose(better2, ref_b, atol=1e-6, rtol=1e-6)

    print("KERNEL_OK")
</pallas_src>

<mosaic_0001>
module attributes {stable_mosaic.version = 11 : i64} {
  func.func @_cmp_wc_kernel(%arg0: i32, %arg1: memref<1xf32, #tpu.memory_space<smem>>, %arg2: memref<256x10xf32, #tpu.memory_space<vmem>>, %arg3: memref<256x10xf32, #tpu.memory_space<vmem>>, %arg4: memref<256x1xf32, #tpu.memory_space<vmem>>, %arg5: memref<256x1xf32, #tpu.memory_space<vmem>>, %arg6: memref<256x3xf32, #tpu.memory_space<vmem>>) attributes {dimension_semantics = [#tpu.dimension_semantics<parallel>], iteration_bounds = array<i64: 1>, scalar_prefetch = 1 : i64, scratch_operands = 0 : i64, tpu.core_type = #tpu.core_type<tc>, window_params = [{transform_indices = @transform_0, window_bounds = array<i64: 256, 10>}, {transform_indices = @transform_1, window_bounds = array<i64: 256, 10>}, {transform_indices = @transform_2, window_bounds = array<i64: 256, 1>}, {transform_indices = @transform_3, window_bounds = array<i64: 256, 1>}, {transform_indices = @transform_4, window_bounds = array<i64: 256, 3>}]} {
    %c0 = arith.constant 0 : index
    %0 = memref.load %arg1[%c0] : memref<1xf32, #tpu.memory_space<smem>>
    %c0_0 = arith.constant 0 : index
    %c0_1 = arith.constant 0 : index
    %1 = vector.load %arg2[%c0_0, %c0_1] : memref<256x10xf32, #tpu.memory_space<vmem>>, vector<256x10xf32>
    %2 = vector.broadcast %0 : f32 to vector<256x10xf32>
    %3 = arith.cmpf ogt, %1, %2 : vector<256x10xf32>
    %4 = arith.extui %3 : vector<256x10xi1> to vector<256x10xi32>
    %5 = arith.sitofp %4 : vector<256x10xi32> to vector<256x10xf32>
    %cst = arith.constant dense<0.000000e+00> : vector<256xf32>
    %6 = vector.multi_reduction <add>, %5, %cst [1] : vector<256x10xf32> to vector<256xf32>
    %7 = vector.shape_cast %6 : vector<256xf32> to vector<256x1xf32>
    %c0_2 = arith.constant 0 : index
    %c0_3 = arith.constant 0 : index
    %8 = vector.load %arg3[%c0_2, %c0_3] : memref<256x10xf32, #tpu.memory_space<vmem>>, vector<256x10xf32>
    %9 = vector.broadcast %0 : f32 to vector<256x10xf32>
    %10 = arith.cmpf ogt, %8, %9 : vector<256x10xf32>
    %11 = arith.extui %10 : vector<256x10xi1> to vector<256x10xi32>
    %12 = arith.sitofp %11 : vector<256x10xi32> to vector<256x10xf32>
    %cst_4 = arith.constant dense<0.000000e+00> : vector<256xf32>
    %13 = vector.multi_reduction <add>, %12, %cst_4 [1] : vector<256x10xf32> to vector<256xf32>
    %14 = vector.shape_cast %13 : vector<256xf32> to vector<256x1xf32>
    %c0_5 = arith.constant 0 : index
    %c0_6 = arith.constant 0 : index
    %15 = vector.load %arg4[%c0_5, %c0_6] : memref<256x1xf32, #tpu.memory_space<vmem>>, vector<256x1xf32>
    %16 = arith.divf %7, %15 : vector<256x1xf32>
    %c0_7 = arith.constant 0 : index
    %c0_8 = arith.constant 0 : index
    %17 = vector.load %arg5[%c0_7, %c0_8] : memref<256x1xf32, #tpu.memory_space<vmem>>, vector<256x1xf32>
    %18 = arith.divf %14, %17 : vector<256x1xf32>
    %19 = arith.maximumf %16, %18 : vector<256x1xf32>
    %20 = tpu.concatenate %16, %18, %19 in 1 : vector<256x1xf32>, vector<256x1xf32>, vector<256x1xf32> -> vector<256x3xf32>
    %c0_9 = arith.constant 0 : index
    %c0_10 = arith.constant 0 : index
    %21 = vector.load %arg6[%c0_9, %c0_10] : memref<256x3xf32, #tpu.memory_space<vmem>>, vector<256x3xf32>
    tpu.vector_store %arg6[%c0_9, %c0_10], %20 {strides = array<i32>} : memref<256x3xf32, #tpu.memory_space<vmem>>, vector<256x3xf32>,
    return
  }
  func.func @transform_0(%arg0: i32, %arg1: memref<1xf32, #tpu.memory_space<smem>>) -> (i32, i32) {
    %c0_i32 = arith.constant 0 : i32
    %c0_i32_0 = arith.constant 0 : i32
    return %arg0, %c0_i32 : i32, i32
  }
  func.func @transform_1(%arg0: i32, %arg1: memref<1xf32, #tpu.memory_space<smem>>) -> (i32, i32) {
    %c0_i32 = arith.constant 0 : i32
    %c0_i32_0 = arith.constant 0 : i32
    return %arg0, %c0_i32 : i32, i32
  }
  func.func @transform_2(%arg0: i32, %arg1: memref<1xf32, #tpu.memory_space<smem>>) -> (i32, i32) {
    %c0_i32 = arith.constant 0 : i32
    %c0_i32_0 = arith.constant 0 : i32
    return %arg0, %c0_i32 : i32, i32
  }
  func.func @transform_3(%arg0: i32, %arg1: memref<1xf32, #tpu.memory_space<smem>>) -> (i32, i32) {
    %c0_i32 = arith.constant 0 : i32
    %c0_i32_0 = arith.constant 0 : i32
    return %arg0, %c0_i32 : i32, i32
  }
  func.func @transform_4(%arg0: i32, %arg1: memref<1xf32, #tpu.memory_space<smem>>) -> (i32, i32) {
    %c0_i32 = arith.constant 0 : i32
    %c0_i32_0 = arith.constant 0 : i32
    return %arg0, %c0_i32 : i32, i32
  }
}

</mosaic_0001>

<bundles_post_ra>
// kernel: tpu_custom_call.1
= control target key start
LH: loop header
LB: loop body
LE: loop exit
PB: predicated region body
PF: predicated region fallthrough
CT: control target
= control target key end

     0   :  { %vm149_vm0 = vcmask 80896   ;;  %v1248_v7 = vmov 0.0   ;;  %s1249_s8 = smov 1   ;;  %s1250_s20 = smov 2   ;;  %s2685_s0 = inlined_call_operand.<no memory space> [shape: f32[1], index: 0, kind: input, shape index: {}]   ;;  %s2686_s1 = inlined_call_operand.vmem [shape: f32[256,10], index: 1, kind: input, shape index: {}]   ;;  %s2687_s2 = inlined_call_operand.vmem [shape: f32[256,10], index: 2, kind: input, shape index: {}]   ;;  %s2688_s4 = inlined_call_operand.vmem [shape: f32[256,1], index: 4, kind: input, shape index: {}]   ;;  %s2689_s3 = inlined_call_operand.vmem [shape: f32[256,1], index: 3, kind: input, shape index: {}]   ;;  %s2690_s5 = inlined_call_operand.vmem [shape: f32[256,3], index: 5, kind: output, shape index: {}]  }
   0x1   :  { %v22_v0 = vld [vmem:[%s2686_s1 + $0x10] sm:$0xff]  ;;  %v1287_v1 = vstv %s2685_s0  ;;  %v20_v2 = vld [vmem:[%s2686_s1] sm:$0xff]  ;;  %v23_v3 = vld [vmem:[%s2686_s1 + $0x18] sm:$0xff] }
   0x2   :  { %vm55_vm1 = vcmp.gt.f32.partialorder %v22_v0, %v1287_v1  ;;  %vm53_vm2 = vcmp.gt.f32.partialorder %v20_v2, %v1287_v1  ;;  %vm56_vm3 = vcmp.gt.f32.partialorder %v23_v3, %v1287_v1  ;;  %v21_v4 = vld [vmem:[%s2686_s1 + $0x8] sm:$0xff]  ;;  %v24_v6 = vld [vmem:[%s2686_s1 + $0x20] sm:$0xff]  ;;  %v27_v14 = vld [vmem:[%s2686_s1 + $0x38] sm:$0xff] }
   0x3   :  { %v25_v5 = vld [vmem:[%s2686_s1 + $0x28] sm:$0xff]  ;;  %v1055_v8 = vsel %vm55_vm1, 1.0, %v1248_v7  ;;  %v1053_v9 = vsel %vm53_vm2, 1.0, %v1248_v7  ;;  %v1056_v10 = vsel %vm56_vm3, 1.0, %v1248_v7  ;;  %vm54_vm4 = vcmp.gt.f32.partialorder %v21_v4, %v1287_v1  ;;  %v26_v15 = vld [vmem:[%s2686_s1 + $0x30] sm:$0xff]  ;;  %v28_v21 = vld [vmem:[%s2686_s1 + $0x40] sm:$0xff] }
   0x4   :  { %v156_v11 = vsel %vm149_vm0, %v1055_v8, 0.0  ;;  %v150_v12 = vsel %vm149_vm0, %v1053_v9, 0.0  ;;  %v1054_v13 = vsel %vm54_vm4, 1.0, %v1248_v7  ;;  %vm58_vm5 = vcmp.gt.f32.partialorder %v25_v5, %v1287_v1  ;;  %v29_v19 = vld [vmem:[%s2686_s1 + $0x48] sm:$0xff]  ;;  %v31_v22 = vld [vmem:[%s2686_s1 + $0x58] sm:$0xff]  ;;  %v30_v23 = vld [vmem:[%s2686_s1 + $0x50] sm:$0xff] }
   0x5   :  { %157 = vadd.xlane.f32.xlu1 %v156_v11  ;;  %151 = vadd.xlane.f32.xlu0 %v150_v12  ;;  %vm57_vm6 = vcmp.gt.f32.partialorder %v24_v6, %v1287_v1  ;;  %v159_v16 = vsel %vm149_vm0, %v1056_v10, 0.0  ;;  %v153_v17 = vsel %vm149_vm0, %v1054_v13, 0.0  ;;  %v1058_v18 = vsel %vm58_vm5, 1.0, %v1248_v7  ;;  %v33_v28 = vld [vmem:[%s2686_s1 + $0x68] sm:$0xff]  ;;  %v32_v29 = vld [vmem:[%s2686_s1 + $0x60] sm:$0xff]  ;;  %v35_v34 = vld [vmem:[%s2686_s1 + $0x78] sm:$0xff] }
   0x6   :  { %v1057_v20 = vsel %vm57_vm6, 1.0, %v1248_v7  ;;  %vm60_vm7 = vcmp.gt.f32.partialorder %v27_v14, %v1287_v1  ;;  %vm59_vm8 = vcmp.gt.f32.partialorder %v26_v15, %v1287_v1  ;;  %v165_v24 = vsel %vm149_vm0, %v1058_v18, 0.0  ;;  %v34_v37 = vld [vmem:[%s2686_s1 + $0x70] sm:$0xff]  ;;  %v37_v38 = vld [vmem:[%s2686_s1 + $0x88] sm:$0xff]  ;;  %v36_v39 = vld [vmem:[%s2686_s1 + $0x80] sm:$0xff] }
   0x7   :  { %vm62_vm9 = vcmp.gt.f32.partialorder %v29_v19, %v1287_v1  ;;  %v162_v25 = vsel %vm149_vm0, %v1057_v20, 0.0  ;;  %vm61_vm10 = vcmp.gt.f32.partialorder %v28_v21, %v1287_v1  ;;  %vm64_vm11 = vcmp.gt.f32.partialorder %v31_v22, %v1287_v1  ;;  %v39_v41 = vld [vmem:[%s2686_s1 + $0x98] sm:$0xff]  ;;  %v38_v42 = vld [vmem:[%s2686_s1 + $0x90] sm:$0xff]  ;;  %v41_v43 = vld [vmem:[%s2686_s1 + $0xa8] sm:$0xff] }
   0x8   :  { %vm63_vm12 = vcmp.gt.f32.partialorder %v30_v23, %v1287_v1  ;;  %v1060_v26 = vsel %vm60_vm7, 1.0, %v1248_v7  ;;  %v1059_v27 = vsel %vm59_vm8, 1.0, %v1248_v7  ;;  %v1062_v30 = vsel %vm62_vm9, 1.0, %v1248_v7  ;;  %v40_v47 = vld [vmem:[%s2686_s1 + $0xa0] sm:$0xff]  ;;  %v43_v48 = vld [vmem:[%s2686_s1 + $0xb8] sm:$0xff]  ;;  %v42_v49 = vld [vmem:[%s2686_s1 + $0xb0] sm:$0xff] }
   0x9   :  { %160 = vadd.xlane.f32.xlu1 %v159_v16  ;;  %154 = vadd.xlane.f32.xlu0 %v153_v17  ;;  %v1061_v31 = vsel %vm61_vm10, 1.0, %v1248_v7  ;;  %v1064_v32 = vsel %vm64_vm11, 1.0, %v1248_v7  ;;  %v1063_v33 = vsel %vm63_vm12, 1.0, %v1248_v7  ;;  %v171_v35 = vsel %vm149_vm0, %v1060_v26, 0.0  ;;  %v45_v53 = vld [vmem:[%s2686_s1 + $0xc8] sm:$0xff]  ;;  %v44_v58 = vld [vmem:[%s2686_s1 + $0xc0] sm:$0xff] }
   0xa   :  { %v168_v36 = vsel %vm149_vm0, %v1059_v27, 0.0  ;;  %vm66_vm13 = vcmp.gt.f32.partialorder %v33_v28, %v1287_v1  ;;  %vm65_vm14 = vcmp.gt.f32.partialorder %v32_v29, %v1287_v1  ;;  %v177_v40 = vsel %vm149_vm0, %v1062_v30, 0.0  ;;  %v247_v6 = vld [vmem:[%s2687_s2 + $0x8] sm:$0xff]  ;;  %v246_v8 = vld [vmem:[%s2687_s2] sm:$0xff]  ;;  %v249_v9 = vld [vmem:[%s2687_s2 + $0x18] sm:$0xff] }
   0xb   :  { %v174_v44 = vsel %vm149_vm0, %v1061_v31, 0.0  ;;  %v183_v45 = vsel %vm149_vm0, %v1064_v32, 0.0  ;;  %v180_v46 = vsel %vm149_vm0, %v1063_v33, 0.0  ;;  %vm68_vm15 = vcmp.gt.f32.partialorder %v35_v34, %v1287_v1  ;;  %v248_v14 = vld [vmem:[%s2687_s2 + $0x10] sm:$0xff]  ;;  %v251_v20 = vld [vmem:[%s2687_s2 + $0x28] sm:$0xff]  ;;  %v250_v21 = vld [vmem:[%s2687_s2 + $0x20] sm:$0xff] }
   0xc   :  { %v1066_v50 = vsel %vm66_vm13, 1.0, %v1248_v7  ;;  %v1065_v51 = vsel %vm65_vm14, 1.0, %v1248_v7  ;;  %vm67_vm1 = vcmp.gt.f32.partialorder %v34_v37, %v1287_v1  ;;  %vm70_vm2 = vcmp.gt.f32.partialorder %v37_v38, %v1287_v1  ;;  %v253_v22 = vld [vmem:[%s2687_s2 + $0x38] sm:$0xff]  ;;  %v252_v26 = vld [vmem:[%s2687_s2 + $0x30] sm:$0xff]  ;;  %v255_v32 = vld [vmem:[%s2687_s2 + $0x48] sm:$0xff] }
   0xd   :  { %166 = vadd.xlane.f32.xlu1 %v165_v24  ;;  %163 = vadd.xlane.f32.xlu0 %v162_v25  ;;  %vm69_vm3 = vcmp.gt.f32.partialorder %v36_v39, %v1287_v1  ;;  %vm72_vm4 = vcmp.gt.f32.partialorder %v39_v41, %v1287_v1  ;;  %vm71_vm5 = vcmp.gt.f32.partialorder %v38_v42, %v1287_v1  ;;  %v1068_v52 = vsel %vm68_vm15, 1.0, %v1248_v7  ;;  %v254_v33 = vld [vmem:[%s2687_s2 + $0x40] sm:$0xff]  ;;  %v257_v34 = vld [vmem:[%s2687_s2 + $0x58] sm:$0xff]  ;;  %v256_v38 = vld [vmem:[%s2687_s2 + $0x50] sm:$0xff] }
   0xe   :  { %vm74_vm6 = vcmp.gt.f32.partialorder %v41_v43, %v1287_v1  ;;  %vm73_vm7 = vcmp.gt.f32.partialorder %v40_v47, %v1287_v1  ;;  %vm76_vm8 = vcmp.gt.f32.partialorder %v43_v48, %v1287_v1  ;;  %vm75_vm9 = vcmp.gt.f32.partialorder %v42_v49, %v1287_v1 }
   0xf   :  { %v189_v54 = vsel %vm149_vm0, %v1066_v50, 0.0  ;;  %v186_v55 = vsel %vm149_vm0, %v1065_v51, 0.0  ;;  %v1067_v56 = vsel %vm67_vm1, 1.0, %v1248_v7  ;;  %v1070_v57 = vsel %vm70_vm2, 1.0, %v1248_v7  ;;  %v260_v50 = vld [vmem:[%s2687_s2 + $0x70] sm:$0xff] }
  0x10   :  { %v1069_v59 = vsel %vm69_vm3, 1.0, %v1248_v7  ;;  %v1072_v60 = vsel %vm72_vm4, 1.0, %v1248_v7  ;;  %v1071_v61 = vsel %vm71_vm5, 1.0, %v1248_v7  ;;  %v1074_v62 = vsel %vm74_vm6, 1.0, %v1248_v7 }
  0x11   :  { %172 = vadd.xlane.f32.xlu1 %v171_v35  ;;  %169 = vadd.xlane.f32.xlu0 %v168_v36  ;;  %v1073_v63 = vsel %vm73_vm7, 1.0, %v1248_v7  ;;  %v1076_v0 = vsel %vm76_vm8, 1.0, %v1248_v7  ;;  %v1075_v2 = vsel %vm75_vm9, 1.0, %v1248_v7  ;;  %vm78_vm10 = vcmp.gt.f32.partialorder %v45_v53, %v1287_v1 }
  0x12   :  { %v195_v3 = vsel %vm149_vm0, %v1068_v52, 0.0  ;;  %v192_v4 = vsel %vm149_vm0, %v1067_v56, 0.0  ;;  %v1448_v5 = vsel %vm149_vm0, %v1070_v57, 0.0  ;;  %vm77_vm11 = vcmp.gt.f32.partialorder %v44_v58, %v1287_v1  ;;  %v263_v56 = vld [vmem:[%s2687_s2 + $0x88] sm:$0xff]  ;;  %v262_v57 = vld [vmem:[%s2687_s2 + $0x80] sm:$0xff]  ;;  %v265_v58 = vld [vmem:[%s2687_s2 + $0x98] sm:$0xff] }
  0x13   :  { %v1461_v10 = vsel %vm149_vm0, %v1069_v59, 0.0  ;;  %v1464_v11 = vsel %vm149_vm0, %v1072_v60, 0.0  ;;  %v1467_v12 = vsel %vm149_vm0, %v1071_v61, 0.0  ;;  %v1470_v13 = vsel %vm149_vm0, %v1074_v62, 0.0  ;;  %v264_v62 = vld [vmem:[%s2687_s2 + $0x90] sm:$0xff] }
  0x14   :  { %v1476_v15 = vsel %vm149_vm0, %v1073_v63, 0.0  ;;  %v1479_v16 = vsel %vm149_vm0, %v1076_v0, 0.0  ;;  %v1482_v17 = vsel %vm149_vm0, %v1075_v2, 0.0  ;;  %v1487_v18 = vsel %vm78_vm10, 1.0, %v1248_v7  ;;  %v1612_v63 = vld [vmem:[%s2686_s1 + $0xd8] sm:$0xff]  ;;  %v1617_v0 = vld [vmem:[%s2686_s1 + $0xd0] sm:$0xff] }
  0x15   :  { %178 = vadd.xlane.f32.xlu1 %v177_v40  ;;  %175 = vadd.xlane.f32.xlu0 %v174_v44  ;;  %v1490_v19 = vsel %vm77_vm11, 1.0, %v1248_v7  ;;  %vm279_vm12 = vcmp.gt.f32.partialorder %v247_v6, %v1287_v1  ;;  %vm278_vm13 = vcmp.gt.f32.partialorder %v246_v8, %v1287_v1  ;;  %vm281_vm14 = vcmp.gt.f32.partialorder %v249_v9, %v1287_v1  ;;  %v259_v44 = vld [vmem:[%s2687_s2 + $0x68] sm:$0xff]  ;;  %v266_v9 = vld [vmem:[%s2687_s2 + $0xa0] sm:$0xff] }
  0x16   :  { %v1086_v23 = vsel %vm279_vm12, 1.0, %v1248_v7  ;;  %v1085_v24 = vsel %vm278_vm13, 1.0, %v1248_v7  ;;  %v1088_v25 = vsel %vm281_vm14, 1.0, %v1248_v7  ;;  %vm280_vm15 = vcmp.gt.f32.partialorder %v248_v14, %v1287_v1  ;;  %v267_v8 = vld [vmem:[%s2687_s2 + $0xa8] sm:$0xff] }
  0x17   :  { %v1512_v27 = vsel %vm149_vm0, %v1086_v23, 0.0  ;;  %v1515_v28 = vsel %vm149_vm0, %v1085_v24, 0.0  ;;  %v1518_v29 = vsel %vm149_vm0, %v1088_v25, 0.0  ;;  %v1087_v30 = vsel %vm280_vm15, 1.0, %v1248_v7 }
  0x18   :  { %v1522_v31 = vsel %vm149_vm0, %v1087_v30, 0.0  ;;  %vm283_vm1 = vcmp.gt.f32.partialorder %v251_v20, %v1287_v1  ;;  %vm282_vm2 = vcmp.gt.f32.partialorder %v250_v21, %v1287_v1  ;;  %vm285_vm3 = vcmp.gt.f32.partialorder %v253_v22, %v1287_v1  ;;  %v268_v22 = vld [vmem:[%s2687_s2 + $0xb0] sm:$0xff] }
  0x19   :  { %184 = vadd.xlane.f32.xlu1 %v183_v45  ;;  %181 = vadd.xlane.f32.xlu0 %v180_v46  ;;  %v1090_v35 = vsel %vm283_vm1, 1.0, %v1248_v7  ;;  %v1089_v36 = vsel %vm282_vm2, 1.0, %v1248_v7  ;;  %v1092_v37 = vsel %vm285_vm3, 1.0, %v1248_v7  ;;  %vm284_vm4 = vcmp.gt.f32.partialorder %v252_v26, %v1287_v1  ;;  %v258_v45 = vld [vmem:[%s2687_s2 + $0x60] sm:$0xff]  ;;  %v261_v46 = vld [vmem:[%s2687_s2 + $0x78] sm:$0xff] }
  0x1a   :  { %v1544_v39 = vsel %vm149_vm0, %v1090_v35, 0.0  ;;  %v1547_v40 = vsel %vm149_vm0, %v1089_v36, 0.0  ;;  %v1550_v41 = vsel %vm149_vm0, %v1092_v37, 0.0  ;;  %v1091_v42 = vsel %vm284_vm4, 1.0, %v1248_v7  ;;  %v272_v36 = vld [vmem:[%s2687_s2 + $0xd0] sm:$0xff] }
  0x1b   :  { %v1554_v43 = vsel %vm149_vm0, %v1091_v42, 0.0  ;;  %vm287_vm5 = vcmp.gt.f32.partialorder %v255_v32, %v1287_v1  ;;  %vm286_vm6 = vcmp.gt.f32.partialorder %v254_v33, %v1287_v1  ;;  %vm289_vm7 = vcmp.gt.f32.partialorder %v257_v34, %v1287_v1  ;;  %v271_v32 = vld [vmem:[%s2687_s2 + $0xc8] sm:$0xff]  ;;  %v270_v33 = vld [vmem:[%s2687_s2 + $0xc0] sm:$0xff] }
  0x1c   :  { %v1094_v47 = vsel %vm287_vm5, 1.0, %v1248_v7  ;;  %v1093_v48 = vsel %vm286_vm6, 1.0, %v1248_v7  ;;  %v1096_v49 = vsel %vm289_vm7, 1.0, %v1248_v7  ;;  %vm288_vm8 = vcmp.gt.f32.partialorder %v256_v38, %v1287_v1 }
  0x1d   :  { %190 = vadd.xlane.f32.xlu1 %v189_v54  ;;  %187 = vadd.xlane.f32.xlu0 %v186_v55  ;;  %v1576_v51 = vsel %vm149_vm0, %v1094_v47, 0.0  ;;  %v1579_v52 = vsel %vm149_vm0, %v1093_v48, 0.0  ;;  %v1582_v53 = vsel %vm149_vm0, %v1096_v49, 0.0  ;;  %v1095_v54 = vsel %vm288_vm8, 1.0, %v1248_v7  ;;  %v274_v47 = vld [vmem:[%s2687_s2 + $0xe0] sm:$0xff]  ;;  %v277_v48 = vld [vmem:[%s2687_s2 + $0xf8] sm:$0xff] }
  0x1e   :  { %v1586_v55 = vsel %vm149_vm0, %v1095_v54, 0.0  ;;  %vm291_vm9 = vcmp.gt.f32.partialorder %v259_v44, %v1287_v1  ;;  %vm290_vm10 = vcmp.gt.f32.partialorder %v258_v45, %v1287_v1  ;;  %vm293_vm11 = vcmp.gt.f32.partialorder %v261_v46, %v1287_v1  ;;  %v275_v46 = vld [vmem:[%s2687_s2 + $0xe8] sm:$0xff] }
  0x1f   :  { %v1098_v59 = vsel %vm291_vm9, 1.0, %v1248_v7  ;;  %v1097_v60 = vsel %vm290_vm10, 1.0, %v1248_v7  ;;  %v1100_v61 = vsel %vm293_vm11, 1.0, %v1248_v7  ;;  %vm292_vm12 = vcmp.gt.f32.partialorder %v260_v50, %v1287_v1 }
  0x20   :  { %v1620_v2 = vsel %vm149_vm0, %v1098_v59, 0.0  ;;  %vm295_vm13 = vcmp.gt.f32.partialorder %v263_v56, %v1287_v1  ;;  %vm294_vm14 = vcmp.gt.f32.partialorder %v262_v57, %v1287_v1  ;;  %vm297_vm15 = vcmp.gt.f32.partialorder %v265_v58, %v1287_v1  ;;  %v276_v56 = vld [vmem:[%s2687_s2 + $0xf0] sm:$0xff] }
  0x21   :  { %196 = vadd.xlane.f32.xlu1 %v195_v3  ;;  %193 = vadd.xlane.f32.xlu0 %v192_v4  ;;  %v1623_v3 = vsel %vm149_vm0, %v1097_v60, 0.0  ;;  %v1626_v4 = vsel %vm149_vm0, %v1100_v61, 0.0  ;;  %v1102_v14 = vsel %vm295_vm13, 1.0, %v1248_v7  ;;  %v1101_v20 = vsel %vm294_vm14, 1.0, %v1248_v7 }
  0x22   :  { %v1104_v21 = vsel %vm297_vm15, 1.0, %v1248_v7  ;;  %vm296_vm1 = vcmp.gt.f32.partialorder %v264_v62, %v1287_v1  ;;  %vm80_vm2 = vcmp.gt.f32.partialorder %v1612_v63, %v1287_v1  ;;  %vm79_vm3 = vcmp.gt.f32.partialorder %v1617_v0, %v1287_v1 }
  0x23   :  { %v1656_v23 = vsel %vm149_vm0, %v1102_v14, 0.0  ;;  %v1659_v24 = vsel %vm149_vm0, %v1101_v20, 0.0  ;;  %v1662_v25 = vsel %vm149_vm0, %v1104_v21, 0.0  ;;  %v1103_v26 = vsel %vm296_vm1, 1.0, %v1248_v7 }
  0x24   :  { %v1668_v30 = vsel %vm149_vm0, %v1103_v26, 0.0  ;;  %vm299_vm4 = vcmp.gt.f32.partialorder %v267_v8, %v1287_v1  ;;  %vm298_vm5 = vcmp.gt.f32.partialorder %v266_v9, %v1287_v1  ;;  %vm300_vm7 = vcmp.gt.f32.partialorder %v268_v22, %v1287_v1  ;;  %v48_v8 = vld [vmem:[%s2686_s1 + $0xe0] sm:$0xff] }
  0x25   :  { %202 = vadd.xlane.f32.xlu1 %v1448_v5  ;;  %199 = vadd.xlane.f32.xlu0 %v1461_v10  ;;  %v1099_v5 = vsel %vm292_vm12, 1.0, %v1248_v7  ;;  %v269_v10 = vld [vmem:[%s2687_s2 + $0xb8] sm:$0xff]  ;;  %v1105_v34 = vsel %vm298_vm5, 1.0, %v1248_v7  ;;  %v1107_v44 = vsel %vm300_vm7, 1.0, %v1248_v7  ;;  %vm303_vm8 = vcmp.gt.f32.partialorder %v271_v32, %v1287_v1 }
  0x26   :  { %v1630_v6 = vsel %vm149_vm0, %v1099_v5, 0.0  ;;  %vm301_vm6 = vcmp.gt.f32.partialorder %v269_v10, %v1287_v1  ;;  %v1693_v38 = vsel %vm149_vm0, %v1105_v34, 0.0  ;;  %v1700_v45 = vsel %vm149_vm0, %v1107_v44, 0.0  ;;  %v49_v5 = vld [vmem:[%s2686_s1 + $0xe8] sm:$0xff] }
  0x27   :  { %v1108_v35 = vsel %vm301_vm6, 1.0, %v1248_v7  ;;  %vm302_vm9 = vcmp.gt.f32.partialorder %v270_v33, %v1287_v1  ;;  %v1110_v49 = vsel %vm303_vm8, 1.0, %v1248_v7  ;;  %vm304_vm11 = vcmp.gt.f32.partialorder %v272_v36, %v1287_v1 }
  0x28   :  { %v1696_v42 = vsel %vm149_vm0, %v1108_v35, 0.0  ;;  %v1109_v50 = vsel %vm302_vm9, 1.0, %v1248_v7  ;;  %v1724_v57 = vsel %vm149_vm0, %v1110_v49, 0.0  ;;  %vm307_vm12 = vcmp.gt.f32.partialorder %v275_v46, %v1287_v1  ;;  %v567_v46 = vld [vmem:[%s2688_s4 + $0x8] sm:$0xff] }
  0x29   :  { %208 = vadd.xlane.f32.xlu1 %v1464_v11  ;;  %205 = vadd.xlane.f32.xlu0 %v1467_v12  ;;  %v273_v11 = vld [vmem:[%s2687_s2 + $0xd8] sm:$0xff]  ;;  %v1106_v12 = vsel %vm299_vm4, 1.0, %v1248_v7  ;;  %v1727_v58 = vsel %vm149_vm0, %v1109_v50, 0.0  ;;  %vm306_vm13 = vcmp.gt.f32.partialorder %v274_v47, %v1287_v1  ;;  %vm309_vm14 = vcmp.gt.f32.partialorder %v277_v48, %v1287_v1  ;;  %v566_v47 = vld [vmem:[%s2688_s4] sm:$0xff]  ;;  %v568_v50 = vld [vmem:[%s2688_s4 + $0x10] sm:$0xff] }
  0x2a   :  { %v1690_v37 = vsel %vm149_vm0, %v1106_v12, 0.0  ;;  %vm305_vm10 = vcmp.gt.f32.partialorder %v273_v11, %v1287_v1  ;;  %v1114_v60 = vsel %vm307_vm12, 1.0, %v1248_v7  ;;  %v1113_v61 = vsel %vm306_vm13, 1.0, %v1248_v7 }
  0x2b   :  { %v1112_v54 = vsel %vm305_vm10, 1.0, %v1248_v7  ;;  %v1116_v62 = vsel %vm309_vm14, 1.0, %v1248_v7  ;;  %vm308_vm15 = vcmp.gt.f32.partialorder %v276_v56, %v1287_v1  ;;  %v461_v9 = vsel %vm149_vm0, %v1114_v60, 0.0 }
  0x2c   :  { %v458_v10 = vsel %vm149_vm0, %v1113_v61, 0.0  ;;  %v467_v14 = vsel %vm149_vm0, %v1116_v62, 0.0  ;;  %v1115_v20 = vsel %vm308_vm15, 1.0, %v1248_v7  ;;  %v1080_v22 = vsel %vm80_vm2, 1.0, %v1248_v7  ;;  %v572_v61 = vld [vmem:[%s2688_s4 + $0x30] sm:$0xff] }
  0x2d   :  { %214 = vadd.xlane.f32.xlu1 %v1470_v13  ;;  %211 = vadd.xlane.f32.xlu0 %v1476_v15  ;;  %v1730_v13 = vsel %vm149_vm0, %v1112_v54, 0.0  ;;  %v1111_v15 = vsel %vm304_vm11, 1.0, %v1248_v7  ;;  %v464_v21 = vsel %vm149_vm0, %v1115_v20, 0.0  ;;  %v1079_v26 = vsel %vm79_vm3, 1.0, %v1248_v7  ;;  %v574_v20 = vld [vmem:[%s2688_s4 + $0x40] sm:$0xff] }
  0x2e   :  { %v1734_v59 = vsel %vm149_vm0, %v1111_v15, 0.0  ;;  %vm82_vm1 = vcmp.gt.f32.partialorder %v49_v5, %v1287_v1  ;;  %vm81_vm4 = vcmp.gt.f32.partialorder %v48_v8, %v1287_v1  ;;  %v231_v63 = vsel %vm149_vm0, %v1080_v22, 0.0  ;;  %v575_v22 = vld [vmem:[%s2688_s4 + $0x48] sm:$0xff] }
  0x2f   :  { %v228_v32 = vsel %vm149_vm0, %v1079_v26, 0.0  ;;  %v1082_v0 = vsel %vm82_vm1, 1.0, %v1248_v7  ;;  %v1081_v33 = vsel %vm81_vm4, 1.0, %v1248_v7  ;;  %1120 = vrcp.f32 %v567_v46 }
  0x30   :  { %v237_v11 = vsel %vm149_vm0, %v1082_v0, 0.0  ;;  %v234_v12 = vsel %vm149_vm0, %v1081_v33, 0.0  ;;  %1122 = vrcp.f32 %v566_v47  ;;  %v577_v33 = vld [vmem:[%s2688_s4 + $0x58] sm:$0xff]  ;;  %v579_v47 = vld [vmem:[%s2688_s4 + $0x68] sm:$0xff]  ;;  %vm983_vm5 = vcmask 15360  }
  0x31   :  { %220 = vadd.xlane.f32.xlu1 %v1479_v16  ;;  %217 = vadd.xlane.f32.xlu0 %v1482_v17  ;;  %v225_v16 = vsel %vm149_vm0, %v1487_v18, 0.0  ;;  %v222_v17 = vsel %vm149_vm0, %v1490_v19, 0.0  ;;  %v51_v18 = vld [vmem:[%s2686_s1 + $0xf8] sm:$0xff]  ;;  %v50_v19 = vld [vmem:[%s2686_s1 + $0xf0] sm:$0xff]  ;;  %1124 = vrcp.f32 %v568_v50  ;;  %vm1016_vm6 = vcmask 23552  }
  0x32   :  { %vm84_vm2 = vcmp.gt.f32.partialorder %v51_v18, %v1287_v1  ;;  %vm83_vm3 = vcmp.gt.f32.partialorder %v50_v19, %v1287_v1  ;;  %v576_v19 = vld [vmem:[%s2688_s4 + $0x50] sm:$0xff] }
  0x33   :  { %v1084_v34 = vsel %vm84_vm2, 1.0, %v1248_v7  ;;  %v1083_v35 = vsel %vm83_vm3, 1.0, %v1248_v7 }
  0x34   :  { %v243_v36 = vsel %vm149_vm0, %v1084_v34, 0.0  ;;  %v240_v44 = vsel %vm149_vm0, %v1083_v35, 0.0  ;;  %v578_v35 = vld [vmem:[%s2688_s4 + $0x60] sm:$0xff]  ;;  %vm950_vm0 = vcmask 7168  }
  0x35   :  { %226 = vadd.xlane.f32.xlu1 %v225_v16  ;;  %223 = vadd.xlane.f32.xlu0 %v222_v17 }
  0x39   :  { %232 = vadd.xlane.f32.xlu1 %v231_v63  ;;  %229 = vadd.xlane.f32.xlu0 %v228_v32  ;;  %v1121_v60 = vpop.eup %1120 }
  0x3a   :  { %v1123_v62 = vpop.eup %1122 }
  0x3b   :  { %v1125_v16 = vpop.eup %1124 }
  0x3d   :  { %238 = vadd.xlane.f32.xlu1 %v237_v11  ;;  %235 = vadd.xlane.f32.xlu0 %v234_v12 }
  0x41   :  { %244 = vadd.xlane.f32.xlu1 %v243_v36  ;;  %241 = vadd.xlane.f32.xlu0 %v240_v44 }
  0x45   :  { %378 = vadd.xlane.f32.xlu1 %v1512_v27  ;;  %375 = vadd.xlane.f32.xlu0 %v1515_v28 }
  0x49   :  { %384 = vadd.xlane.f32.xlu1 %v1518_v29  ;;  %381 = vadd.xlane.f32.xlu0 %v1522_v31 }
  0x4d   :  { %390 = vadd.xlane.f32.xlu1 %v1544_v39  ;;  %387 = vadd.xlane.f32.xlu0 %v1547_v40 }
  0x51   :  { %396 = vadd.xlane.f32.xlu1 %v1550_v41  ;;  %393 = vadd.xlane.f32.xlu0 %v1554_v43 }
  0x55   :  { %402 = vadd.xlane.f32.xlu1 %v1576_v51  ;;  %399 = vadd.xlane.f32.xlu0 %v1579_v52 }
  0x59   :  { %408 = vadd.xlane.f32.xlu1 %v1582_v53  ;;  %405 = vadd.xlane.f32.xlu0 %v1586_v55 }
  0x5d   :  { %414 = vadd.xlane.f32.xlu1 %v1620_v2  ;;  %411 = vadd.xlane.f32.xlu0 %v1623_v3 }
  0x61   :  { %420 = vadd.xlane.f32.xlu1 %v1626_v4  ;;  %417 = vadd.xlane.f32.xlu0 %v1630_v6 }
  0x65   :  { %426 = vadd.xlane.f32.xlu1 %v1656_v23  ;;  %423 = vadd.xlane.f32.xlu0 %v1659_v24 }
  0x69   :  { %432 = vadd.xlane.f32.xlu1 %v1662_v25  ;;  %429 = vadd.xlane.f32.xlu0 %v1668_v30 }
  0x6d   :  { %438 = vadd.xlane.f32.xlu1 %v1690_v37  ;;  %435 = vadd.xlane.f32.xlu0 %v1693_v38 }
  0x71   :  { %444 = vadd.xlane.f32.xlu1 %v1696_v42  ;;  %441 = vadd.xlane.f32.xlu0 %v1700_v45 }
  0x75   :  { %450 = vadd.xlane.f32.xlu1 %v1724_v57  ;;  %447 = vadd.xlane.f32.xlu0 %v1727_v58  ;;  %v569_v57 = vld [vmem:[%s2688_s4 + $0x18] sm:$0xff]  ;;  %v570_v58 = vld [vmem:[%s2688_s4 + $0x20] sm:$0xff] }
  0x76   :  { %1126 = vrcp.f32 %v569_v57 }
  0x77   :  { %1128 = vrcp.f32 %v570_v58 }
  0x79   :  { %456 = vadd.xlane.f32.xlu1 %v1730_v13  ;;  %453 = vadd.xlane.f32.xlu0 %v1734_v59  ;;  %v571_v59 = vld [vmem:[%s2688_s4 + $0x28] sm:$0xff] }
  0x7a   :  { %1130 = vrcp.f32 %v571_v59  ;;  %v580_v59 = vld [vmem:[%s2688_s4 + $0x70] sm:$0xff] }
  0x7b   :  { %1132 = vrcp.f32 %v572_v61 }
  0x7d   :  { %462 = vadd.xlane.f32.xlu1 %v461_v9  ;;  %459 = vadd.xlane.f32.xlu0 %v458_v10  ;;  %v573_v9 = vld [vmem:[%s2688_s4 + $0x38] sm:$0xff] }
  0x7e   :  { %1134 = vrcp.f32 %v573_v9 }
  0x7f   :  { %1136 = vrcp.f32 %v574_v20 }
  0x80   :  { %v1127_v26 = vpop.eup %1126  ;;  %1138 = vrcp.f32 %v575_v22 }
  0x81   :  { %468 = vadd.xlane.f32.xlu1 %v467_v14  ;;  %465 = vadd.xlane.f32.xlu0 %v464_v21  ;;  %v1129_v63 = vpop.eup %1128  ;;  %1140 = vrcp.f32 %v576_v19 }
  0x82   :  { %1142 = vrcp.f32 %v577_v33 }
  0x83   :  { %1144 = vrcp.f32 %v578_v35 }
  0x84   :  { %v1131_v11 = vpop.eup %1130  ;;  %1146 = vrcp.f32 %v579_v47 }
  0x85   :  { %v1133_v36 = vpop.eup %1132  ;;  %1148 = vrcp.f32 %v580_v59 }
  0x88   :  { %v1135_v50 = vpop.eup %1134 }
  0x92   :  { %v1816_v1 = vpop.xlane.xlu1 %157  ;;  %v1818_v7 = vpop.xlane.xlu0 %151 }
  0x96   :  { %v1820_v27 = vpop.xlane.xlu1 %160  ;;  %v1822_v28 = vpop.xlane.xlu0 %154 }
  0x9a   :  { %v1824_v29 = vpop.xlane.xlu1 %166  ;;  %v1826_v31 = vpop.xlane.xlu0 %163 }
  0x9e   :  { %v1828_v39 = vpop.xlane.xlu1 %172  ;;  %v1830_v40 = vpop.xlane.xlu0 %169 }
  0xa2   :  { %v1832_v41 = vpop.xlane.xlu1 %178  ;;  %v1834_v43 = vpop.xlane.xlu0 %175 }
  0xa6   :  { %v1836_v51 = vpop.xlane.xlu1 %184  ;;  %v1838_v52 = vpop.xlane.xlu0 %181 }
  0xaa   :  { %v1840_v53 = vpop.xlane.xlu1 %190  ;;  %v1842_v55 = vpop.xlane.xlu0 %187 }
  0xae   :  { %v1844_v2 = vpop.xlane.xlu1 %196  ;;  %v1846_v3 = vpop.xlane.xlu0 %193 }
  0xb2   :  { %v1848_v4 = vpop.xlane.xlu1 %202  ;;  %v1850_v6 = vpop.xlane.xlu0 %199 }
  0xb6   :  { %v1852_v23 = vpop.xlane.xlu1 %208  ;;  %v1854_v24 = vpop.xlane.xlu0 %205 }
  0xba   :  { %v1856_v25 = vpop.xlane.xlu1 %214  ;;  %v1858_v30 = vpop.xlane.xlu0 %211 }
  0xbe   :  { %v1860_v37 = vpop.xlane.xlu1 %220  ;;  %v1862_v38 = vpop.xlane.xlu0 %217 }
  0xc2   :  { %v1864_v42 = vpop.xlane.xlu1 %226  ;;  %v1866_v45 = vpop.xlane.xlu0 %223 }
  0xc3   :  { %2700 = vst [vmem:[#allocation4_spill] sm:$0xff] %v1864_v42  ;;  %v474_v42 = vld [vmem:[%s2689_s3 + $0x20] sm:$0xff] }
  0xc6   :  { %v1874_v48 = vpop.xlane.xlu1 %232  ;;  %v1876_v49 = vpop.xlane.xlu0 %229 }
  0xc7   :  { %2701 = vst [vmem:[#allocation5_spill] sm:$0xff] %v1874_v48  ;;  %2702 = vst [vmem:[#allocation6_spill] sm:$0xff] %v1876_v49  ;;  %v472_v48 = vld [vmem:[%s2689_s3 + $0x10] sm:$0xff]  ;;  %v473_v49 = vld [vmem:[%s2689_s3 + $0x18] sm:$0xff] }
  0xca   :  { %v1881_v54 = vpop.xlane.xlu1 %238  ;;  %v1883_v56 = vpop.xlane.xlu0 %235 }
  0xcb   :  { %2703 = vst [vmem:[#allocation7_spill] sm:$0xff] %v1881_v54  ;;  %2704 = vst [vmem:[#allocation8_spill] sm:$0xff] %v1883_v56  ;;  %v597_v54 = vld [vmem:[%s2688_s4 + $0xf8] sm:$0xff] }
  0xce   :  { %v1891_v13 = vpop.xlane.xlu1 %244  ;;  %v1893_v15 = vpop.xlane.xlu0 %241 }
  0xcf   :  { %2705 = vst [vmem:[#allocation9_spill] sm:$0xff] %v1891_v13  ;;  %2706 = vst [vmem:[#allocation10_spill] sm:$0xff] %v1893_v15 }
  0xd2   :  { %v379_v5 = vpop.xlane.xlu1 %378  ;;  %v376_v8 = vpop.xlane.xlu0 %375 }
  0xd3   :  { %v1904_v10 = vmul.f32 %v1121_v60, %v379_v5  ;;  %v1906_v14 = vmul.f32 %v1123_v62, %v376_v8  ;;  %v1137_v60 = vpop.eup %1136  ;;  %v581_v5 = vld [vmem:[%s2688_s4 + $0x78] sm:$0xff] }
  0xd4   :  { %v1139_v8 = vpop.eup %1138  ;;  %1150 = vrcp.f32 %v581_v5 }
  0xd5   :  { %728 = vrot.lane.b32.xlu1 %v1904_v10, %s1249_s8  ;;  %726 = vrot.lane.b32.xlu0 %v1906_v14, %s1249_s8 }
  0xd6   :  { %v385_v17 = vpop.xlane.xlu1 %384  ;;  %v382_v21 = vpop.xlane.xlu0 %381 }
  0xd7   :  { %v1918_v18 = vmul.f32 %v1125_v16, %v382_v21  ;;  %v1928_v12 = vmul.f32 %v1127_v26, %v385_v17  ;;  %v582_v16 = vld [vmem:[%s2688_s4 + $0x80] sm:$0xff]  ;;  %v1141_v17 = vpop.eup %1140  ;;  %v583_v26 = vld [vmem:[%s2688_s4 + $0x88] sm:$0xff] }
  0xd8   :  { %1152 = vrcp.f32 %v582_v16  ;;  %v1143_v19 = vpop.eup %1142 }
  0xd9   :  { %730 = vrot.lane.b32.xlu1 %v1918_v18, %s1249_s8  ;;  %v1145_v33 = vpop.eup %1144  ;;  %1154 = vrcp.f32 %v583_v26 }
  0xda   :  { %v391_v32 = vpop.xlane.xlu1 %390  ;;  %v388_v0 = vpop.xlane.xlu0 %387 }
  0xdb   :  { %v1930_v34 = vmul.f32 %v1129_v63, %v388_v0  ;;  %v1942_v57 = vmul.f32 %v1131_v11, %v391_v32  ;;  %v584_v0 = vld [vmem:[%s2688_s4 + $0x90] sm:$0xff] }
  0xdc   :  { %1156 = vrcp.f32 %v584_v0 }
  0xdd   :  { %732 = vrot.lane.b32.xlu1 %v1928_v12, %s1249_s8  ;;  %734 = vrot.lane.b32.xlu0 %v1930_v34, %s1249_s8 }
  0xde   :  { %v397_v44 = vpop.xlane.xlu1 %396  ;;  %v394_v46 = vpop.xlane.xlu0 %393 }
  0xdf   :  { %v1944_v58 = vmul.f32 %v1133_v36, %v394_v46  ;;  %v1956_v9 = vmul.f32 %v1135_v50, %v397_v44  ;;  %v585_v36 = vld [vmem:[%s2688_s4 + $0x98] sm:$0xff]  ;;  %v1147_v44 = vpop.eup %1146  ;;  %v586_v50 = vld [vmem:[%s2688_s4 + $0xa0] sm:$0xff] }
  0xe0   :  { %v1149_v59 = vpop.eup %1148  ;;  %1158 = vrcp.f32 %v585_v36 }
  0xe1   :  { %736 = vrot.lane.b32.xlu1 %v1942_v57, %s1249_s8  ;;  %738 = vrot.lane.b32.xlu0 %v1944_v58, %s1249_s8  ;;  %1160 = vrcp.f32 %v586_v50  ;;  %v1151_v5 = vpop.eup %1150 }
  0xe2   :  { %v403_v61 = vpop.xlane.xlu1 %402  ;;  %v400_v62 = vpop.xlane.xlu0 %399 }
  0xe3   :  { %v1958_v20 = vmul.f32 %v1137_v60, %v400_v62  ;;  %v1970_v63 = vmul.f32 %v1139_v8, %v403_v61  ;;  %v587_v62 = vld [vmem:[%s2688_s4 + $0xa8] sm:$0xff] }
  0xe4   :  { %1162 = vrcp.f32 %v587_v62 }
  0xe5   :  { %740 = vrot.lane.b32.xlu1 %v1956_v9, %s1249_s8  ;;  %742 = vrot.lane.b32.xlu0 %v1958_v20, %s1249_s8 }
  0xe6   :  { %v409_v21 = vpop.xlane.xlu1 %408  ;;  %v406_v22 = vpop.xlane.xlu0 %405 }
  0xe7   :  { %v1972_v32 = vmul.f32 %v1141_v17, %v406_v22  ;;  %v1984_v46 = vmul.f32 %v1143_v19, %v409_v21  ;;  %v588_v17 = vld [vmem:[%s2688_s4 + $0xb0] sm:$0xff]  ;;  %v1153_v21 = vpop.eup %1152  ;;  %v589_v19 = vld [vmem:[%s2688_s4 + $0xb8] sm:$0xff] }
  0xe8   :  { %1164 = vrcp.f32 %v588_v17  ;;  %v1155_v0 = vpop.eup %1154 }
  0xe9   :  { %744 = vrot.lane.b32.xlu1 %v1970_v63, %s1249_s8  ;;  %746 = vrot.lane.b32.xlu0 %v1972_v32, %s1249_s8  ;;  %v1157_v36 = vpop.eup %1156  ;;  %1166 = vrcp.f32 %v589_v19 }
  0xea   :  { %v415_v11 = vpop.xlane.xlu1 %414  ;;  %v412_v35 = vpop.xlane.xlu0 %411 }
  0xeb   :  { %v1986_v47 = vmul.f32 %v1145_v33, %v412_v35  ;;  %v1998_v8 = vmul.f32 %v1147_v44, %v415_v11  ;;  %v590_v35 = vld [vmem:[%s2688_s4 + $0xc0] sm:$0xff] }
  0xec   :  { %1168 = vrcp.f32 %v590_v35 }
  0xed   :  { %748 = vrot.lane.b32.xlu1 %v1984_v46, %s1249_s8  ;;  %750 = vrot.lane.b32.xlu0 %v1986_v47, %s1249_s8 }
  0xee   :  { %v421_v60 = vpop.xlane.xlu1 %420  ;;  %v418_v61 = vpop.xlane.xlu0 %417 }
  0xef   :  { %v2000_v16 = vmul.f32 %v1149_v59, %v418_v61  ;;  %v2012_v33 = vmul.f32 %v1151_v5, %v421_v60  ;;  %v591_v59 = vld [vmem:[%s2688_s4 + $0xc8] sm:$0xff]  ;;  %v1159_v60 = vpop.eup %1158  ;;  %v592_v5 = vld [vmem:[%s2688_s4 + $0xd0] sm:$0xff] }
  0xf0   :  { %v1161_v17 = vpop.eup %1160  ;;  %1170 = vrcp.f32 %v591_v59 }
  0xf1   :  { %752 = vrot.lane.b32.xlu1 %v1998_v8, %s1249_s8  ;;  %754 = vrot.lane.b32.xlu0 %v2000_v16, %s1249_s8  ;;  %1172 = vrcp.f32 %v592_v5  ;;  %v1163_v19 = vpop.eup %1162 }
  0xf2   :  { %v427_v22 = vpop.xlane.xlu1 %426  ;;  %v424_v26 = vpop.xlane.xlu0 %423 }
  0xf3   :  { %v2014_v11 = vmul.f32 %v1153_v21, %v424_v26  ;;  %v2026_v61 = vmul.f32 %v1155_v0, %v427_v22  ;;  %v593_v22 = vld [vmem:[%s2688_s4 + $0xd8] sm:$0xff] }
  0xf4   :  { %1174 = vrcp.f32 %v593_v22  ;;  %v470_v22 = vld [vmem:[%s2689_s3] sm:$0xff] }
  0xf5   :  { %756 = vrot.lane.b32.xlu1 %v2012_v33, %s1249_s8  ;;  %758 = vrot.lane.b32.xlu0 %v2014_v11, %s1249_s8 }
  0xf6   :  { %v433_v44 = vpop.xlane.xlu1 %432  ;;  %v430_v50 = vpop.xlane.xlu0 %429 }
  0xf7   :  { %v2028_v62 = vmul.f32 %v1157_v36, %v430_v50  ;;  %v2040_v0 = vmul.f32 %v1159_v60, %v433_v44  ;;  %v594_v36 = vld [vmem:[%s2688_s4 + $0xe0] sm:$0xff]  ;;  %v1165_v50 = vpop.eup %1164  ;;  %v595_v44 = vld [vmem:[%s2688_s4 + $0xe8] sm:$0xff] }
  0xf8   :  { %1176 = vrcp.f32 %v594_v36  ;;  %v1167_v60 = vpop.eup %1166 }
  0xf9   :  { %760 = vrot.lane.b32.xlu1 %v2026_v61, %s1249_s8  ;;  %762 = vrot.lane.b32.xlu0 %v2028_v62, %s1249_s8  ;;  %v1169_v15 = vpop.eup %1168  ;;  %1178 = vrcp.f32 %v595_v44  ;;  %v471_v44 = vld [vmem:[%s2689_s3 + $0x8] sm:$0xff] }
  0xfa   :  { %v439_v21 = vpop.xlane.xlu1 %438  ;;  %v436_v26 = vpop.xlane.xlu0 %435 }
  0xfb   :  { %v2042_v35 = vmul.f32 %v1161_v17, %v436_v26  ;;  %v2054_v5 = vmul.f32 %v1163_v19, %v439_v21  ;;  %v596_v26 = vld [vmem:[%s2688_s4 + $0xf0] sm:$0xff] }
  0xfc   :  { %1180 = vrcp.f32 %v596_v26 }
  0xfd   :  { %764 = vrot.lane.b32.xlu1 %v2040_v0, %s1249_s8  ;;  %766 = vrot.lane.b32.xlu0 %v2042_v35, %s1249_s8  ;;  %1182 = vrcp.f32 %v470_v22 }
  0xfe   :  { %v445_v59 = vpop.xlane.xlu1 %444  ;;  %v442_v13 = vpop.xlane.xlu0 %441  ;;  %1184 = vrcp.f32 %v597_v54 }
  0xff   :  { %v2056_v17 = vmul.f32 %v1165_v50, %v442_v13  ;;  %v1171_v13 = vpop.eup %1170  ;;  %v2068_v36 = vmul.f32 %v1167_v60, %v445_v59  ;;  %1186 = vrcp.f32 %v472_v48 }
 0x100   :  { %v1173_v56 = vpop.eup %1172  ;;  %1188 = vrcp.f32 %v471_v44  ;;  %v475_v44 = vld [vmem:[%s2689_s3 + $0x28] sm:$0xff] }
 0x101   :  { %768 = vrot.lane.b32.xlu1 %v2054_v5, %s1249_s8  ;;  %770 = vrot.lane.b32.xlu0 %v2056_v17, %s1249_s8  ;;  %v1175_v60 = vpop.eup %1174  ;;  %1190 = vrcp.f32 %v473_v49 }
 0x102   :  { %v451_v21 = vpop.xlane.xlu1 %450  ;;  %v448_v19 = vpop.xlane.xlu0 %447  ;;  %1192 = vrcp.f32 %v474_v42  ;;  %v477_v42 = vld [vmem:[%s2689_s3 + $0x38] sm:$0xff] }
 0x103   :  { %v2070_v50 = vmul.f32 %v1169_v15, %v448_v19  ;;  %v2085_v26 = vmul.f32 %v1171_v13, %v451_v21  ;;  %v1177_v22 = vpop.eup %1176  ;;  %1194 = vrcp.f32 %v475_v44 }
 0x105   :  { %2707 = vst [vmem:[#allocation11_spill] sm:$0xff] %v2070_v50  ;;  %772 = vrot.lane.b32.xlu1 %v2068_v36, %s1249_s8  ;;  %774 = vrot.lane.b32.xlu0 %v2070_v50, %s1249_s8  ;;  %2708 = vst [vmem:[#allocation12_spill] sm:$0xff] %v2085_v26 }
 0x106   :  { %v457_v15 = vpop.xlane.xlu1 %456  ;;  %v454_v59 = vpop.xlane.xlu0 %453 }
 0x107   :  { %v2087_v19 = vmul.f32 %v1173_v56, %v454_v59  ;;  %v1179_v56 = vpop.eup %1178  ;;  %v2099_v21 = vmul.f32 %v1175_v60, %v457_v15 }
 0x108   :  { %v1181_v59 = vpop.eup %1180 }
 0x109   :  { %2709 = vst [vmem:[#allocation13_spill] sm:$0xff] %v2087_v19  ;;  %776 = vrot.lane.b32.xlu1 %v2085_v26, %s1249_s8  ;;  %778 = vrot.lane.b32.xlu0 %v2087_v19, %s1249_s8  ;;  %2710 = vst [vmem:[#allocation14_spill] sm:$0xff] %v2099_v21  ;;  %v476_v26 = vld [vmem:[%s2689_s3 + $0x30] sm:$0xff]  ;;  %v1183_v49 = vpop.eup %1182 }
 0x10a   :  { %v463_v48 = vpop.xlane.xlu1 %462  ;;  %v460_v54 = vpop.xlane.xlu0 %459  ;;  %1196 = vrcp.f32 %v476_v26 }
 0x10b   :  { %v2101_v13 = vmul.f32 %v1177_v22, %v460_v54  ;;  %v2113_v60 = vmul.f32 %v1179_v56, %v463_v48  ;;  %v1185_v54 = vpop.eup %1184  ;;  %1198 = vrcp.f32 %v477_v42  ;;  %v482_v42 = vld [vmem:[%s2689_s3 + $0x60] sm:$0xff] }
 0x10c   :  { %v1187_v50 = vpop.eup %1186 }
 0x10d   :  { %2711 = vst [vmem:[#allocation15_spill] sm:$0xff] %v2101_v13  ;;  %780 = vrot.lane.b32.xlu1 %v2099_v21, %s1249_s8  ;;  %782 = vrot.lane.b32.xlu0 %v2101_v13, %s1249_s8  ;;  %v2121_v21 = vmul.f32 %v1183_v49, %v1818_v7  ;;  %v478_v13 = vld [vmem:[%s2689_s3 + $0x40] sm:$0xff]  ;;  %v1189_v48 = vpop.eup %1188  ;;  %v479_v7 = vld [vmem:[%s2689_s3 + $0x48] sm:$0xff]  ;;  %v2138_v44 = vmul.f32 %v1187_v50, %v1816_v1 }
 0x10e   :  { %v466_v15 = vpop.xlane.xlu0 %465  ;;  %v469_v19 = vpop.xlane.xlu1 %468  ;;  %1200 = vrcp.f32 %v478_v13  ;;  %v2141_v49 = vmul.f32 %v1189_v48, %v1822_v28  ;;  %v481_v28 = vld [vmem:[%s2689_s3 + $0x58] sm:$0xff] }
 0x10f   :  { %v2115_v22 = vmul.f32 %v1181_v59, %v466_v15  ;;  %v662_v26 = vmax.f32 %v2121_v21, %v1906_v14  ;;  %v2132_v56 = vmul.f32 %v1185_v54, %v469_v19  ;;  %v1191_v59 = vpop.eup %1190  ;;  %v480_v15 = vld [vmem:[%s2689_s3 + $0x50] sm:$0xff]  ;;  %1202 = vrcp.f32 %v479_v7 }
 0x110   :  { %v1193_v14 = vpop.eup %1192  ;;  %v663_v19 = vmax.f32 %v2141_v49, %v1904_v10  ;;  %v664_v1 = vmax.f32 %v2138_v44, %v1918_v18  ;;  %1204 = vrcp.f32 %v480_v15  ;;  %v2157_v13 = vmul.f32 %v1191_v59, %v1820_v27  ;;  %v484_v59 = vld [vmem:[%s2689_s3 + $0x70] sm:$0xff] }
 0x111   :  { %784 = vrot.lane.b32.xlu1 %v2113_v60, %s1249_s8  ;;  %786 = vrot.lane.b32.xlu0 %v2115_v22, %s1249_s8  ;;  %v1195_v50 = vpop.eup %1194  ;;  %v2160_v54 = vmul.f32 %v1193_v14, %v1826_v31  ;;  %1206 = vrcp.f32 %v481_v28  ;;  %v483_v31 = vld [vmem:[%s2689_s3 + $0x68] sm:$0xff] }
 0x112   :  { %v665_v18 = vmax.f32 %v2157_v13, %v1928_v12  ;;  %1208 = vrcp.f32 %v482_v42 }
 0x113   :  { %v666_v27 = vmax.f32 %v2160_v54, %v1930_v34  ;;  %1210 = vrcp.f32 %v483_v31 }
 0x114   :  { %v1197_v10 = vpop.eup %1196  ;;  %1212 = vrcp.f32 %v484_v59 }
 0x115   :  { %788 = vrot.lane.b32.xlu1 %v2132_v56, %s1249_s8  ;;  %854 = vrot.lane.b32.xlu0 %v662_v26, %s1250_s20  ;;  %v1199_v48 = vpop.eup %1198  ;;  %v2175_v26 = vmul.f32 %v1195_v50, %v1824_v29  ;;  %v2178_v7 = vmul.f32 %v1197_v10, %v1830_v40  ;;  %v485_v40 = vld [vmem:[%s2689_s3 + $0x78] sm:$0xff]  ;;  %v488_v10 = vld [vmem:[%s2689_s3 + $0x90] sm:$0xff] }
 0x116   :  { %v2193_v14 = vmul.f32 %v1199_v48, %v1828_v39  ;;  %1214 = vrcp.f32 %v485_v40  ;;  %v490_v48 = vld [vmem:[%s2689_s3 + $0xa0] sm:$0xff] }
 0x117   :  { %v667_v34 = vmax.f32 %v2175_v26, %v1942_v57  ;;  %v668_v29 = vmax.f32 %v2178_v7, %v1944_v58 }
 0x118   :  { %v1201_v12 = vpop.eup %1200  ;;  %v669_v58 = vmax.f32 %v2193_v14, %v1956_v9 }
 0x119   :  { %856 = vrot.lane.b32.xlu1 %v663_v19, %s1250_s20  ;;  %858 = vrot.lane.b32.xlu0 %v664_v1, %s1250_s20  ;;  %v1203_v15 = vpop.eup %1202  ;;  %v2196_v19 = vmul.f32 %v1201_v12, %v1834_v43  ;;  %v486_v1 = vld [vmem:[%s2689_s3 + $0x80] sm:$0xff]  ;;  %v487_v43 = vld [vmem:[%s2689_s3 + $0x88] sm:$0xff] }
 0x11a   :  { %v1205_v57 = vpop.eup %1204  ;;  %1216 = vrcp.f32 %v486_v1  ;;  %v2211_v50 = vmul.f32 %v1203_v15, %v1832_v41 }
 0x11b   :  { %v670_v39 = vmax.f32 %v2196_v19, %v1958_v20  ;;  %v1207_v28 = vpop.eup %1206  ;;  %v2214_v42 = vmul.f32 %v1205_v57, %v1838_v52  ;;  %1218 = vrcp.f32 %v487_v43  ;;  %v489_v52 = vld [vmem:[%s2689_s3 + $0x98] sm:$0xff]  ;;  %v494_v57 = vld [vmem:[%s2689_s3 + $0xc0] sm:$0xff] }
 0x11c   :  { %v1209_v9 = vpop.eup %1208  ;;  %v671_v20 = vmax.f32 %v2211_v50, %v1970_v63  ;;  %1220 = vrcp.f32 %v488_v10 }
 0x11d   :  { %860 = vrot.lane.b32.xlu1 %v665_v18, %s1250_s20  ;;  %862 = vrot.lane.b32.xlu0 %v666_v27, %s1250_s20  ;;  %v672_v41 = vmax.f32 %v2214_v42, %v1972_v32  ;;  %v1211_v18 = vpop.eup %1210  ;;  %v2229_v27 = vmul.f32 %v1207_v28, %v1836_v51  ;;  %v2232_v31 = vmul.f32 %v1209_v9, %v1842_v55  ;;  %1222 = vrcp.f32 %v489_v52  ;;  %v491_v55 = vld [vmem:[%s2689_s3 + $0xa8] sm:$0xff]  ;;  %v496_v28 = vld [vmem:[%s2689_s3 + $0xd0] sm:$0xff] }
 0x11e   :  { %v1213_v63 = vpop.eup %1212  ;;  %1224 = vrcp.f32 %v490_v48  ;;  %v2247_v12 = vmul.f32 %v1211_v18, %v1840_v53 }
 0x11f   :  { %v673_v32 = vmax.f32 %v2229_v27, %v1984_v46  ;;  %v674_v51 = vmax.f32 %v2232_v31, %v1986_v47  ;;  %1226 = vrcp.f32 %v491_v55  ;;  %v501_v55 = vld [vmem:[%s2689_s3 + $0xf8] sm:$0xff] }
 0x120   :  { %v1215_v59 = vpop.eup %1214  ;;  %v675_v47 = vmax.f32 %v2247_v12, %v1998_v8 }
 0x121   :  { %864 = vrot.lane.b32.xlu1 %v667_v34, %s1250_s20  ;;  %866 = vrot.lane.b32.xlu0 %v668_v29, %s1250_s20  ;;  %v2250_v34 = vmul.f32 %v1213_v63, %v1846_v3  ;;  %v492_v29 = vld [vmem:[%s2689_s3 + $0xb0] sm:$0xff]  ;;  %v493_v3 = vld [vmem:[%s2689_s3 + $0xb8] sm:$0xff]  ;;  %v2265_v15 = vmul.f32 %v1215_v59, %v1844_v2 }
 0x122   :  { %1228 = vrcp.f32 %v492_v29  ;;  %v500_v63 = vld [vmem:[%s2689_s3 + $0xf0] sm:$0xff]  ;;  %v2712_v59 = vld [vmem:[#allocation11_spill] sm:$0xff] }
 0x123   :  { %v676_v53 = vmax.f32 %v2250_v34, %v2000_v16  ;;  %1230 = vrcp.f32 %v493_v3  ;;  %v677_v16 = vmax.f32 %v2265_v15, %v2012_v33 }
 0x124   :  { %v1217_v46 = vpop.eup %1216  ;;  %1232 = vrcp.f32 %v494_v57 }
 0x125   :  { %868 = vrot.lane.b32.xlu1 %v669_v58, %s1250_s20  ;;  %870 = vrot.lane.b32.xlu0 %v670_v39, %s1250_s20  ;;  %v1219_v40 = vpop.eup %1218  ;;  %v2268_v1 = vmul.f32 %v1217_v46, %v1850_v6  ;;  %v495_v6 = vld [vmem:[%s2689_s3 + $0xc8] sm:$0xff]  ;;  %v2713_v46 = vld [vmem:[#allocation4_spill] sm:$0xff] }
 0x126   :  { %v1221_v8 = vpop.eup %1220  ;;  %v2283_v39 = vmul.f32 %v1219_v40, %v1848_v4  ;;  %1234 = vrcp.f32 %v495_v6  ;;  %v2715_v40 = vld [vmem:[#allocation12_spill] sm:$0xff]  ;;  %v2717_v6 = vld [vmem:[#allocation5_spill] sm:$0xff] }
 0x127   :  { %v678_v2 = vmax.f32 %v2268_v1, %v2014_v11  ;;  %v1223_v58 = vpop.eup %1222  ;;  %v2286_v43 = vmul.f32 %v1221_v8, %v1854_v24  ;;  %v497_v24 = vld [vmem:[%s2689_s3 + $0xd8] sm:$0xff]  ;;  %1236 = vrcp.f32 %v496_v28  ;;  %v2718_v28 = vld [vmem:[#allocation8_spill] sm:$0xff] }
 0x128   :  { %v1225_v33 = vpop.eup %1224  ;;  %v679_v11 = vmax.f32 %v2283_v39, %v2026_v61  ;;  %v2301_v9 = vmul.f32 %v1223_v58, %v1852_v23  ;;  %1238 = vrcp.f32 %v497_v24 }
 0x129   :  { %872 = vrot.lane.b32.xlu1 %v671_v20, %s1250_s20  ;;  %874 = vrot.lane.b32.xlu0 %v672_v41, %s1250_s20  ;;  %v680_v4 = vmax.f32 %v2286_v43, %v2028_v62  ;;  %v1227_v10 = vpop.eup %1226  ;;  %v2304_v20 = vmul.f32 %v1225_v33, %v1858_v30  ;;  %v498_v41 = vld [vmem:[%s2689_s3 + $0xe0] sm:$0xff]  ;;  %v499_v30 = vld [vmem:[%s2689_s3 + $0xe8] sm:$0xff] }
 0x12a   :  { %v681_v62 = vmax.f32 %v2301_v9, %v2040_v0  ;;  %1240 = vrcp.f32 %v498_v41  ;;  %v2319_v18 = vmul.f32 %v1227_v10, %v1856_v25  ;;  %v2721_v10 = vld [vmem:[#allocation15_spill] sm:$0xff] }
 0x12b   :  { %v682_v23 = vmax.f32 %v2304_v20, %v2042_v35  ;;  %1242 = vrcp.f32 %v499_v30 }
 0x12c   :  { %v1229_v61 = vpop.eup %1228  ;;  %v683_v35 = vmax.f32 %v2319_v18, %v2054_v5  ;;  %1244 = vrcp.f32 %v500_v63 }
 0x12d   :  { %876 = vrot.lane.b32.xlu1 %v673_v32, %s1250_s20  ;;  %878 = vrot.lane.b32.xlu0 %v674_v51, %s1250_s20  ;;  %v1231_v52 = vpop.eup %1230  ;;  %v2322_v48 = vmul.f32 %v1229_v61, %v1862_v38  ;;  %1246 = vrcp.f32 %v501_v55 }
 0x12e   :  { %v1233_v0 = vpop.eup %1232  ;;  %v2334_v38 = vmul.f32 %v1231_v52, %v1860_v37  ;;  %v2724_v52 = vld [vmem:[#allocation10_spill] sm:$0xff] }
 0x12f   :  { %v684_v25 = vmax.f32 %v2322_v48, %v2056_v17  ;;  %v2337_v51 = vmul.f32 %v1233_v0, %v1866_v45 }
 0x130   :  { %v1235_v32 = vpop.eup %1234  ;;  %v685_v17 = vmax.f32 %v2334_v38, %v2068_v36  ;;  %v2716_v36 = vld [vmem:[#allocation13_spill] sm:$0xff] }
 0x131   :  { %880 = vrot.lane.b32.xlu1 %v675_v47, %s1250_s20  ;;  %882 = vrot.lane.b32.xlu0 %v676_v53, %s1250_s20  ;;  %v1237_v5 = vpop.eup %1236  ;;  %v686_v29 = vmax.f32 %v2337_v51, %v2712_v59  ;;  %v2349_v45 = vmul.f32 %v1235_v32, %v2713_v46  ;;  %v2714_v47 = vld [vmem:[#allocation6_spill] sm:$0xff] }
 0x132   :  { %v1239_v37 = vpop.eup %1238  ;;  %v2352_v53 = vmul.f32 %v1237_v5, %v2714_v47  ;;  %v2726_v5 = vld [vmem:[#allocation9_spill] sm:$0xff] }
 0x133   :  { %v687_v57 = vmax.f32 %v2349_v45, %v2715_v40  ;;  %v2361_v58 = vmul.f32 %v1239_v37, %v2717_v6 }
 0x134   :  { %v1241_v3 = vpop.eup %1240  ;;  %v688_v8 = vmax.f32 %v2352_v53, %v2716_v36 }
 0x135   :  { %884 = vrot.lane.b32.xlu1 %v677_v16, %s1250_s20  ;;  %886 = vrot.lane.b32.xlu0 %v678_v2, %s1250_s20  ;;  %v1243_v2 = vpop.eup %1242  ;;  %v2364_v33 = vmul.f32 %v1241_v3, %v2718_v28 }
 0x137   :  { %2719 = vst [vmem:[#allocation11_spill] sm:$0xff] %v2364_v33  ;;  %v690_v41 = vmax.f32 %v2364_v33, %v2721_v10 }
 0x139   :  { %888 = vrot.lane.b32.xlu1 %v679_v11, %s1250_s20  ;;  %890 = vrot.lane.b32.xlu0 %v680_v4, %s1250_s20  ;;  %v1245_v11 = vpop.eup %1244  ;;  %v2720_v4 = vld [vmem:[#allocation14_spill] sm:$0xff] }
 0x13a   :  { %v689_v24 = vmax.f32 %v2361_v58, %v2720_v4  ;;  %v2376_v63 = vmul.f32 %v1245_v11, %v2724_v52  ;;  %v1247_v0 = vpop.eup %1246 }
 0x13c   :  { %2725 = vst [vmem:[#allocation6_spill] sm:$0xff] %v2376_v63 }
 0x13d   :  { %892 = vrot.lane.b32.xlu1 %v681_v62, %s1250_s20  ;;  %894 = vrot.lane.b32.xlu0 %v682_v23, %s1250_s20  ;;  %v2722_v23 = vld [vmem:[#allocation7_spill] sm:$0xff] }
 0x13e   :  { %v2373_v30 = vmul.f32 %v1243_v2, %v2722_v23 }
 0x140   :  { %2723 = vst [vmem:[#allocation4_spill] sm:$0xff] %v2373_v30 }
 0x141   :  { %896 = vrot.lane.b32.xlu1 %v683_v35, %s1250_s20  ;;  %898 = vrot.lane.b32.xlu0 %v684_v25, %s1250_s20  ;;  %v691_v35 = vmax.f32 %v2373_v30, %v2113_v60  ;;  %v692_v25 = vmax.f32 %v2376_v63, %v2115_v22 }
 0x145   :  { %900 = vrot.lane.b32.xlu1 %v685_v17, %s1250_s20  ;;  %902 = vrot.lane.b32.xlu0 %v686_v29, %s1250_s20  ;;  %v2385_v17 = vmul.f32 %v1247_v0, %v2726_v5 }
 0x147   :  { %v729_v16 = vpop.permute.xlu1 %728  ;;  %v727_v61 = vpop.permute.xlu0 %726  ;;  %2727 = vst [vmem:[#allocation12_spill] sm:$0xff] %v2385_v17  ;;  %v693_v59 = vmax.f32 %v2385_v17, %v2132_v56 }
 0x149   :  { %904 = vrot.lane.b32.xlu1 %v687_v57, %s1250_s20  ;;  %906 = vrot.lane.b32.xlu0 %v688_v8, %s1250_s20 }
 0x14b   :  { %v731_v62 = vpop.permute.xlu1 %730 }
 0x14d   :  { %908 = vrot.lane.b32.xlu1 %v689_v24, %s1250_s20  ;;  %910 = vrot.lane.b32.xlu0 %v690_v41, %s1250_s20 }
 0x14f   :  { %v733_v32 = vpop.permute.xlu1 %732  ;;  %v735_v55 = vpop.permute.xlu0 %734 }
 0x151   :  { %912 = vrot.lane.b32.xlu1 %v691_v35, %s1250_s20  ;;  %914 = vrot.lane.b32.xlu0 %v692_v25, %s1250_s20 }
 0x153   :  { %v737_v29 = vpop.permute.xlu1 %736  ;;  %v739_v37 = vpop.permute.xlu0 %738 }
 0x155   :  { %916 = vrot.lane.b32.xlu1 %v693_v59, %s1250_s20  ;;  %v951_v59 = vsel %vm950_vm0, %v2121_v21, %v727_v61 }
 0x157   :  { %v741_v60 = vpop.permute.xlu1 %740  ;;  %v743_v46 = vpop.permute.xlu0 %742 }
 0x15b   :  { %v2392_v47 = vpop.permute.xlu1 %744  ;;  %v2394_v22 = vpop.permute.xlu0 %746 }
 0x15f   :  { %v2396_v3 = vpop.permute.xlu1 %748  ;;  %v2398_v40 = vpop.permute.xlu0 %750 }
 0x163   :  { %v2400_v57 = vpop.permute.xlu1 %752  ;;  %v2402_v36 = vpop.permute.xlu0 %754 }
 0x167   :  { %v2404_v8 = vpop.permute.xlu1 %756  ;;  %v2406_v56 = vpop.permute.xlu0 %758 }
 0x16b   :  { %v2408_v2 = vpop.permute.xlu1 %760  ;;  %v2410_v6 = vpop.permute.xlu0 %762 }
 0x16f   :  { %v2412_v28 = vpop.permute.xlu1 %764  ;;  %v2414_v11 = vpop.permute.xlu0 %766 }
 0x173   :  { %v2416_v4 = vpop.permute.xlu1 %768  ;;  %v2418_v24 = vpop.permute.xlu0 %770 }
 0x177   :  { %v2420_v10 = vpop.permute.xlu1 %772  ;;  %v2422_v41 = vpop.permute.xlu0 %774 }
 0x17b   :  { %v2424_v23 = vpop.permute.xlu1 %776  ;;  %v2426_v52 = vpop.permute.xlu0 %778 }
 0x17f   :  { %v2428_v0 = vpop.permute.xlu1 %780  ;;  %v2430_v35 = vpop.permute.xlu0 %782 }
 0x180   :  { %2728 = vst [vmem:[#allocation13_spill] sm:$0xff] %v2430_v35 }
 0x183   :  { %v2432_v25 = vpop.permute.xlu1 %784  ;;  %v2434_v5 = vpop.permute.xlu0 %786 }
 0x184   :  { %2729 = vst [vmem:[#allocation5_spill] sm:$0xff] %v2432_v25  ;;  %2730 = vst [vmem:[#allocation8_spill] sm:$0xff] %v2434_v5  ;;  %v952_v25 = vsel %vm950_vm0, %v2141_v49, %v729_v16  ;;  %v953_v5 = vsel %vm950_vm0, %v2138_v44, %v731_v62  ;;  %v954_v49 = vsel %vm950_vm0, %v2157_v13, %v733_v32 }
 0x185   :  { %v955_v44 = vsel %vm950_vm0, %v2160_v54, %v735_v55  ;;  %v956_v13 = vsel %vm950_vm0, %v2175_v26, %v737_v29  ;;  %v957_v54 = vsel %vm950_vm0, %v2178_v7, %v739_v37  ;;  %v958_v26 = vsel %vm950_vm0, %v2193_v14, %v741_v60 }
 0x186   :  { %v959_v7 = vsel %vm950_vm0, %v2196_v19, %v743_v46  ;;  %v960_v14 = vsel %vm950_vm0, %v2211_v50, %v2392_v47  ;;  %v961_v19 = vsel %vm950_vm0, %v2214_v42, %v2394_v22  ;;  %v962_v50 = vsel %vm950_vm0, %v2229_v27, %v2396_v3 }
 0x187   :  { %v2438_v17 = vpop.permute.xlu1 %788  ;;  %v855_v63 = vpop.permute.xlu0 %854  ;;  %v963_v42 = vsel %vm950_vm0, %v2232_v31, %v2398_v40  ;;  %v964_v27 = vsel %vm950_vm0, %v2247_v12, %v2400_v57  ;;  %v965_v31 = vsel %vm950_vm0, %v2250_v34, %v2402_v36  ;;  %v966_v12 = vsel %vm950_vm0, %v2265_v15, %v2404_v8 }
 0x188   :  { %v984_v30 = vsel %vm983_vm5, %v951_v59, %v855_v63  ;;  %v967_v34 = vsel %vm950_vm0, %v2268_v1, %v2406_v56  ;;  %v968_v15 = vsel %vm950_vm0, %v2283_v39, %v2408_v2  ;;  %v969_v1 = vsel %vm950_vm0, %v2286_v43, %v2410_v6 }
 0x189   :  { %1017 = vst.msk [vmem:[%s2690_s5] sm:$0xff] %vm1016_vm6, %v984_v30  ;;  %v970_v39 = vsel %vm950_vm0, %v2301_v9, %v2412_v28  ;;  %v971_v43 = vsel %vm950_vm0, %v2304_v20, %v2414_v11  ;;  %v972_v9 = vsel %vm950_vm0, %v2319_v18, %v2416_v4  ;;  %v973_v20 = vsel %vm950_vm0, %v2322_v48, %v2418_v24 }
 0x18a   :  { %v974_v18 = vsel %vm950_vm0, %v2334_v38, %v2420_v10  ;;  %v975_v48 = vsel %vm950_vm0, %v2337_v51, %v2422_v41  ;;  %v976_v38 = vsel %vm950_vm0, %v2349_v45, %v2424_v23  ;;  %v977_v51 = vsel %vm950_vm0, %v2352_v53, %v2426_v52  ;;  %v2731_v53 = vld [vmem:[#allocation13_spill] sm:$0xff]  ;;  %v2732_v23 = vld [vmem:[#allocation11_spill] sm:$0xff] }
 0x18b   :  { %v857_v33 = vpop.permute.xlu1 %856  ;;  %v859_v35 = vpop.permute.xlu0 %858  ;;  %v978_v45 = vsel %vm950_vm0, %v2361_v58, %v2428_v0  ;;  %v979_v52 = vsel %vm950_vm0, %v2732_v23, %v2731_v53  ;;  %v2733_v58 = vld [vmem:[#allocation5_spill] sm:$0xff]  ;;  %v2734_v0 = vld [vmem:[#allocation4_spill] sm:$0xff] }
 0x18c   :  { %v985_v21 = vsel %vm983_vm5, %v952_v25, %v857_v33  ;;  %v986_v61 = vsel %vm983_vm5, %v953_v5, %v859_v35 }
 0x18d   :  { %1018 = vst.msk [vmem:[%s2690_s5 + $0x8] sm:$0xff] %vm1016_vm6, %v985_v21  ;;  %1019 = vst.msk [vmem:[%s2690_s5 + $0x10] sm:$0xff] %vm1016_vm6, %v986_v61 }
 0x18f   :  { %v861_v16 = vpop.permute.xlu1 %860  ;;  %v863_v33 = vpop.permute.xlu0 %862 }
 0x190   :  { %v987_v62 = vsel %vm983_vm5, %v954_v49, %v861_v16  ;;  %v988_v30 = vsel %vm983_vm5, %v955_v44, %v863_v33 }
 0x191   :  { %1020 = vst.msk [vmem:[%s2690_s5 + $0x18] sm:$0xff] %vm1016_vm6, %v987_v62  ;;  %1021 = vst.msk [vmem:[%s2690_s5 + $0x20] sm:$0xff] %vm1016_vm6, %v988_v30 }
 0x193   :  { %v865_v63 = vpop.permute.xlu1 %864  ;;  %v867_v32 = vpop.permute.xlu0 %866 }
 0x194   :  { %v989_v55 = vsel %vm983_vm5, %v956_v13, %v865_v63  ;;  %v990_v35 = vsel %vm983_vm5, %v957_v54, %v867_v32 }
 0x195   :  { %1022 = vst.msk [vmem:[%s2690_s5 + $0x28] sm:$0xff] %vm1016_vm6, %v989_v55  ;;  %1023 = vst.msk [vmem:[%s2690_s5 + $0x30] sm:$0xff] %vm1016_vm6, %v990_v35 }
 0x197   :  { %v869_v29 = vpop.permute.xlu1 %868  ;;  %v871_v37 = vpop.permute.xlu0 %870 }
 0x198   :  { %v991_v25 = vsel %vm983_vm5, %v958_v26, %v869_v29  ;;  %v992_v5 = vsel %vm983_vm5, %v959_v7, %v871_v37 }
 0x199   :  { %1024 = vst.msk [vmem:[%s2690_s5 + $0x38] sm:$0xff] %vm1016_vm6, %v991_v25  ;;  %1025 = vst.msk [vmem:[%s2690_s5 + $0x40] sm:$0xff] %vm1016_vm6, %v992_v5 }
 0x19b   :  { %v873_v60 = vpop.permute.xlu1 %872  ;;  %v875_v46 = vpop.permute.xlu0 %874 }
 0x19c   :  { %v993_v59 = vsel %vm983_vm5, %v960_v14, %v873_v60  ;;  %v994_v21 = vsel %vm983_vm5, %v961_v19, %v875_v46  ;;  %v980_v19 = vsel %vm950_vm0, %v2734_v0, %v2733_v58  ;;  %v2735_v60 = vld [vmem:[#allocation8_spill] sm:$0xff]  ;;  %v2736_v46 = vld [vmem:[#allocation6_spill] sm:$0xff] }
 0x19d   :  { %1026 = vst.msk [vmem:[%s2690_s5 + $0x48] sm:$0xff] %vm1016_vm6, %v993_v59  ;;  %1027 = vst.msk [vmem:[%s2690_s5 + $0x50] sm:$0xff] %vm1016_vm6, %v994_v21  ;;  %v981_v59 = vsel %vm950_vm0, %v2736_v46, %v2735_v60 }
 0x19f   :  { %v877_v47 = vpop.permute.xlu1 %876  ;;  %v879_v22 = vpop.permute.xlu0 %878 }
 0x1a0   :  { %v995_v61 = vsel %vm983_vm5, %v962_v50, %v877_v47  ;;  %v996_v49 = vsel %vm983_vm5, %v963_v42, %v879_v22  ;;  %v2737_v22 = vld [vmem:[#allocation12_spill] sm:$0xff] }
 0x1a1   :  { %1028 = vst.msk [vmem:[%s2690_s5 + $0x58] sm:$0xff] %vm1016_vm6, %v995_v61  ;;  %1029 = vst.msk [vmem:[%s2690_s5 + $0x60] sm:$0xff] %vm1016_vm6, %v996_v49  ;;  %v982_v61 = vsel %vm950_vm0, %v2737_v22, %v2438_v17 }
 0x1a3   :  { %v881_v3 = vpop.permute.xlu1 %880  ;;  %v883_v40 = vpop.permute.xlu0 %882 }
 0x1a4   :  { %v997_v44 = vsel %vm983_vm5, %v964_v27, %v881_v3  ;;  %v998_v16 = vsel %vm983_vm5, %v965_v31, %v883_v40 }
 0x1a5   :  { %1030 = vst.msk [vmem:[%s2690_s5 + $0x68] sm:$0xff] %vm1016_vm6, %v997_v44  ;;  %1031 = vst.msk [vmem:[%s2690_s5 + $0x70] sm:$0xff] %vm1016_vm6, %v998_v16 }
 0x1a7   :  { %v885_v57 = vpop.permute.xlu1 %884  ;;  %v887_v36 = vpop.permute.xlu0 %886 }
 0x1a8   :  { %v999_v33 = vsel %vm983_vm5, %v966_v12, %v885_v57  ;;  %v1000_v62 = vsel %vm983_vm5, %v967_v34, %v887_v36 }
 0x1a9   :  { %1032 = vst.msk [vmem:[%s2690_s5 + $0x78] sm:$0xff] %vm1016_vm6, %v999_v33  ;;  %1033 = vst.msk [vmem:[%s2690_s5 + $0x80] sm:$0xff] %vm1016_vm6, %v1000_v62 }
 0x1ab   :  { %v889_v8 = vpop.permute.xlu1 %888  ;;  %v891_v56 = vpop.permute.xlu0 %890 }
 0x1ac   :  { %v1001_v30 = vsel %vm983_vm5, %v968_v15, %v889_v8  ;;  %v1002_v13 = vsel %vm983_vm5, %v969_v1, %v891_v56 }
 0x1ad   :  { %1034 = vst.msk [vmem:[%s2690_s5 + $0x88] sm:$0xff] %vm1016_vm6, %v1001_v30  ;;  %1035 = vst.msk [vmem:[%s2690_s5 + $0x90] sm:$0xff] %vm1016_vm6, %v1002_v13 }
 0x1af   :  { %v893_v2 = vpop.permute.xlu1 %892  ;;  %v895_v6 = vpop.permute.xlu0 %894 }
 0x1b0   :  { %v1003_v54 = vsel %vm983_vm5, %v970_v39, %v893_v2  ;;  %v1004_v63 = vsel %vm983_vm5, %v971_v43, %v895_v6 }
 0x1b1   :  { %1036 = vst.msk [vmem:[%s2690_s5 + $0x98] sm:$0xff] %vm1016_vm6, %v1003_v54  ;;  %1037 = vst.msk [vmem:[%s2690_s5 + $0xa0] sm:$0xff] %vm1016_vm6, %v1004_v63 }
 0x1b3   :  { %v897_v28 = vpop.permute.xlu1 %896  ;;  %v899_v11 = vpop.permute.xlu0 %898 }
 0x1b4   :  { %v1005_v32 = vsel %vm983_vm5, %v972_v9, %v897_v28  ;;  %v1006_v55 = vsel %vm983_vm5, %v973_v20, %v899_v11 }
 0x1b5   :  { %1038 = vst.msk [vmem:[%s2690_s5 + $0xa8] sm:$0xff] %vm1016_vm6, %v1005_v32  ;;  %1039 = vst.msk [vmem:[%s2690_s5 + $0xb0] sm:$0xff] %vm1016_vm6, %v1006_v55 }
 0x1b7   :  { %v901_v4 = vpop.permute.xlu1 %900  ;;  %v903_v24 = vpop.permute.xlu0 %902 }
 0x1b8   :  { %v1007_v35 = vsel %vm983_vm5, %v974_v18, %v901_v4  ;;  %v1008_v26 = vsel %vm983_vm5, %v975_v48, %v903_v24 }
 0x1b9   :  { %1040 = vst.msk [vmem:[%s2690_s5 + $0xb8] sm:$0xff] %vm1016_vm6, %v1007_v35  ;;  %1041 = vst.msk [vmem:[%s2690_s5 + $0xc0] sm:$0xff] %vm1016_vm6, %v1008_v26 }
 0x1bb   :  { %v905_v10 = vpop.permute.xlu1 %904  ;;  %v907_v41 = vpop.permute.xlu0 %906 }
 0x1bc   :  { %v1009_v7 = vsel %vm983_vm5, %v976_v38, %v905_v10  ;;  %v1010_v29 = vsel %vm983_vm5, %v977_v51, %v907_v41 }
 0x1bd   :  { %1042 = vst.msk [vmem:[%s2690_s5 + $0xc8] sm:$0xff] %vm1016_vm6, %v1009_v7  ;;  %1043 = vst.msk [vmem:[%s2690_s5 + $0xd0] sm:$0xff] %vm1016_vm6, %v1010_v29 }
 0x1bf   :  { %v909_v37 = vpop.permute.xlu1 %908  ;;  %v911_v25 = vpop.permute.xlu0 %910 }
 0x1c0   :  { %v1011_v5 = vsel %vm983_vm5, %v978_v45, %v909_v37  ;;  %v1012_v14 = vsel %vm983_vm5, %v979_v52, %v911_v25 }
 0x1c1   :  { %1044 = vst.msk [vmem:[%s2690_s5 + $0xd8] sm:$0xff] %vm1016_vm6, %v1011_v5  ;;  %1045 = vst.msk [vmem:[%s2690_s5 + $0xe0] sm:$0xff] %vm1016_vm6, %v1012_v14 }
 0x1c3   :  { %v913_v21 = vpop.permute.xlu1 %912  ;;  %v915_v50 = vpop.permute.xlu0 %914 }
 0x1c4   :  { %v1013_v42 = vsel %vm983_vm5, %v980_v19, %v913_v21  ;;  %v1014_v47 = vsel %vm983_vm5, %v981_v59, %v915_v50 }
 0x1c5   :  { %1046 = vst.msk [vmem:[%s2690_s5 + $0xe8] sm:$0xff] %vm1016_vm6, %v1013_v42  ;;  %1047 = vst.msk [vmem:[%s2690_s5 + $0xf0] sm:$0xff] %vm1016_vm6, %v1014_v47 }
 0x1c7   :  { %v917_v49 = vpop.permute.xlu1 %916 }
 0x1c8   :  { %v1015_v27 = vsel %vm983_vm5, %v982_v61, %v917_v49 }
 0x1c9   :  { %1048 = vst.msk [vmem:[%s2690_s5 + $0xf8] sm:$0xff] %vm1016_vm6, %v1015_v27 }

</bundles_post_ra>
